<compile_context>
chip_gen: v7x
topology: tpu7x:2x2x1
jax: 0.10.0
libtpu: 0.0.40
codegen_flags: <defaults>
</compile_context>

<pallas_src>
import jax
import jax.numpy as jnp
from jax.experimental import pallas as pl
from jax.experimental.pallas import tpu as pltpu


def _make_outconv_kernel(use_vpu: bool):
    if use_vpu:
        def kernel(wt_ref, b_ref, x_ref, o_ref):
            # wt_ref: (C_in, C_out)   weight, column per output channel
            # b_ref : (C_out, 1)      bias, already f32
            # x_ref : (Nb, C_in, TP)  pixels on the lane axis
            # o_ref : (Nb, C_out, TP) lane-dense output
            nb, c_out, _ = o_ref.shape
            wt = wt_ref[...].astype(jnp.float32)
            b = b_ref[...]
            for bi in range(nb):                       # Nb is small & static
                x = x_ref[bi].astype(jnp.float32)      # (C_in, TP)
                for o in range(c_out):                 # C_out is tiny & static
                    col = wt[:, o:o + 1]               # (C_in, 1) lane-broadcast
                    row = jnp.sum(x * col, axis=0, keepdims=True)   # (1, TP)
                    o_ref[bi, o:o + 1, :] = (row + b[o:o + 1, :]).astype(o_ref.dtype)
    else:
        def kernel(w_ref, b_ref, x_ref, o_ref):
            # w_ref : (C_out, C_in)   weight (matmul layout)
            # b_ref : (C_out, 1)      bias, already f32
            # x_ref : (Nb, C_in, TP)
            # o_ref : (Nb, C_out, TP)
            nb = o_ref.shape[0]
            b = b_ref[...]
            for bi in range(nb):
                acc = jnp.dot(w_ref[...], x_ref[bi],
                              preferred_element_type=jnp.float32)   # (C_out, TP)
                o_ref[bi] = (acc + b).astype(o_ref.dtype)
    return kernel


def outconv_pallas(x_nchw, weight, bias, *, tile_pix=8192, max_batch_block=8):
    """1x1 Conv2d forward.

    x_nchw: (N, C_in, H, W)
    weight: (C_out, C_in, 1, 1)   -- PyTorch Conv2d weight layout
    bias:   (C_out,)
    returns (N, C_out, H, W)
    """
    N, C_in, H, W = x_nchw.shape
    C_out = weight.shape[0]
    HW = H * W

    # View-only reshape: NCHW -> (N, C_in, H*W). No transpose, no extra HBM pass.
    x3 = x_nchw.reshape(N, C_in, HW)

    # ---- pixel tile (lane axis): as large as possible, multiple of 128 ----
    # Never shrink below the largest 128-multiple <= min(tile_pix, HW); a
    # ragged tail is handled by Pallas block masking (grid uses cdiv), so no
    # wrapper-side pad/slice and no tile collapse for awkward H*W.
    if HW <= tile_pix and (HW < 128 or HW % 128 == 0):
        tp = HW                                   # one lane block covers all pixels
    else:
        tp = max(128, (min(tile_pix, HW) // 128) * 128)
    num_pix_blocks = pl.cdiv(HW, tp)

    # ---- batch packing: amortize per-step overhead for small feature maps ----
    nb = 1
    if num_pix_blocks == 1 and N > 1:
        nb = int(min(N, max_batch_block, max(1, tile_pix // tp)))
    num_batch_blocks = pl.cdiv(N, nb)

    # ---- channel-tiny fast path (VPU FMAs) vs MXU dot -----------------------
    use_vpu = (C_in * C_out <= 64) and (C_in <= 8)

    w2d = weight.reshape(C_out, C_in)
    w_arg = w2d.T if use_vpu else w2d             # (C_in,C_out) cols for the VPU path
    b_col = bias.reshape(C_out, 1).astype(jnp.float32)   # pre-cast: no per-step cast

    itemsize = jnp.dtype(x_nchw.dtype).itemsize
    cost = pl.CostEstimate(
        flops=2 * N * HW * C_in * C_out,
        transcendentals=0,
        bytes_accessed=N * HW * (C_in + C_out) * itemsize
        + w_arg.size * jnp.dtype(w_arg.dtype).itemsize
        + b_col.size * 4,
    )

    out3 = pl.pallas_call(
        _make_outconv_kernel(use_vpu),
        out_shape=jax.ShapeDtypeStruct((N, C_out, HW), x_nchw.dtype),
        grid_spec=pltpu.PrefetchScalarGridSpec(
            num_scalar_prefetch=0,
            grid=(num_batch_blocks, num_pix_blocks),
            in_specs=[
                # Weight / bias: tiny, constant block index -> resident, no re-fetch.
                pl.BlockSpec(w_arg.shape, lambda n, p: (0, 0)),
                pl.BlockSpec((C_out, 1), lambda n, p: (0, 0)),
                # Activations: Nb batch elements x all channels x a pixel tile.
                pl.BlockSpec((nb, C_in, tp), lambda n, p: (n, 0, p)),
            ],
            out_specs=pl.BlockSpec((nb, C_out, tp), lambda n, p: (n, 0, p)),
        ),
        compiler_params=pltpu.CompilerParams(
            # Both grid axes are independent -> megacore sharding on v7x picks
            # whichever axis has blocks (pixels when N==1, batches when HW is small).
            dimension_semantics=("parallel", "parallel")),
        cost_estimate=cost,
    )(w_arg, b_col, x3)

    # (N, C_out, H*W) -> (N, C_out, H, W): view-only reshape, already NCHW.
    return out3.reshape(N, C_out, H, W)


def outconv_reference(x_nchw, weight, bias):
    # Exact-f32 reference (broadcast multiply + sum, no MXU dot).
    w = weight.reshape(weight.shape[0], weight.shape[1])          # (C_out, C_in)
    out = jnp.sum(x_nchw[:, None, :, :, :] * w[None, :, :, None, None], axis=2)
    return out + bias[None, :, None, None]


if __name__ == "__main__":
    key = jax.random.PRNGKey(0)
    kx, kw, kb = jax.random.split(key, 3)

    # --- main check: tiny-channel (VPU) path, exact f32, tight tolerance ---
    N, C_in, C_out, H, W = 2, 4, 3, 16, 16
    x = jax.random.normal(kx, (N, C_in, H, W), dtype=jnp.float32)
    bound = 1.0 / (C_in ** 0.5)
    weight = jax.random.uniform(kw, (C_out, C_in, 1, 1), jnp.float32,
                                minval=-bound, maxval=bound)
    bias = jax.random.uniform(kb, (C_out,), jnp.float32,
                              minval=-bound, maxval=bound)

    out = jax.block_until_ready(outconv_pallas(x, weight, bias))
    ref = outconv_reference(x, weight, bias)
    assert out.shape == (N, C_out, H, W)
    assert jnp.allclose(out, ref, atol=1e-5, rtol=1e-5)

    # --- ragged spatial size: exercises the in-kernel tail masking path ---
    H2, W2 = 10, 15                       # H*W = 150, not a multiple of 128
    x2 = jax.random.normal(kx, (N, C_in, H2, W2), dtype=jnp.float32)
    out2 = jax.block_until_ready(outconv_pallas(x2, weight, bias))
    ref2 = outconv_reference(x2, weight, bias)
    assert out2.shape == (N, C_out, H2, W2)
    assert jnp.allclose(out2, ref2, atol=1e-5, rtol=1e-5)

    # --- larger channel block: exercises the MXU path (loose tolerance sized
    #     for MXU f32-pass rounding; this is a layout/indexing check) ---
    C_in3, C_out3 = 32, 8
    x3 = jax.random.normal(kx, (N, C_in3, H, W), dtype=jnp.float32)
    bound3 = 1.0 / (C_in3 ** 0.5)
    w3 = jax.random.uniform(kw, (C_out3, C_in3, 1, 1), jnp.float32,
                            minval=-bound3, maxval=bound3)
    b3 = jax.random.uniform(kb, (C_out3,), jnp.float32,
                            minval=-bound3, maxval=bound3)
    out3 = jax.block_until_ready(outconv_pallas(x3, w3, b3))
    ref3 = outconv_reference(x3, w3, b3)
    assert jnp.allclose(out3, ref3, atol=5e-2, rtol=5e-2)

    print("KERNEL_OK")
</pallas_src>

<mosaic_0001>
module attributes {stable_mosaic.version = 11 : i64} {
  func.func @kernel(%arg0: i32, %arg1: i32, %arg2: memref<4x3xf32, #tpu.memory_space<vmem>>, %arg3: memref<3x1xf32, #tpu.memory_space<vmem>>, %arg4: memref<2x4x256xf32, #tpu.memory_space<vmem>>, %arg5: memref<2x3x256xf32, #tpu.memory_space<vmem>>) attributes {dimension_semantics = [#tpu.dimension_semantics<parallel>, #tpu.dimension_semantics<parallel>], iteration_bounds = array<i64: 1, 1>, scalar_prefetch = 0 : i64, scratch_operands = 0 : i64, tpu.core_type = #tpu.core_type<tc>, window_params = [{pipeline_mode = #tpu.pipeline_mode<synchronous>, transform_indices = @transform_0, window_bounds = array<i64: 4, 3>}, {pipeline_mode = #tpu.pipeline_mode<synchronous>, transform_indices = @transform_1, window_bounds = array<i64: 3, 1>}, {transform_indices = @transform_2, window_bounds = array<i64: 2, 4, 256>}, {transform_indices = @transform_3, window_bounds = array<i64: 2, 3, 256>}]} {
    %c0 = arith.constant 0 : index
    %c0_0 = arith.constant 0 : index
    %0 = vector.load %arg2[%c0, %c0_0] : memref<4x3xf32, #tpu.memory_space<vmem>>, vector<4x3xf32>
    %c0_1 = arith.constant 0 : index
    %c0_2 = arith.constant 0 : index
    %1 = vector.load %arg3[%c0_1, %c0_2] : memref<3x1xf32, #tpu.memory_space<vmem>>, vector<3x1xf32>
    %c0_3 = arith.constant 0 : index
    %c0_4 = arith.constant 0 : index
    %c0_5 = arith.constant 0 : index
    %2 = vector.load %arg4[%c0_3, %c0_4, %c0_5] : memref<2x4x256xf32, #tpu.memory_space<vmem>>, vector<1x4x256xf32>
    %3 = vector.shape_cast %2 : vector<1x4x256xf32> to vector<4x256xf32>
    %4 = vector.extract_strided_slice %0 {offsets = [0, 0], sizes = [4, 1], strides = [1, 1]} : vector<4x3xf32> to vector<4x1xf32>
    %5 = vector.broadcast %4 : vector<4x1xf32> to vector<4x256xf32>
    %6 = arith.mulf %3, %5 : vector<4x256xf32>
    %cst = arith.constant dense<0.000000e+00> : vector<256xf32>
    %7 = vector.multi_reduction <add>, %6, %cst [0] : vector<4x256xf32> to vector<256xf32>
    %8 = vector.shape_cast %7 : vector<256xf32> to vector<1x256xf32>
    %9 = vector.extract_strided_slice %1 {offsets = [0, 0], sizes = [1, 1], strides = [1, 1]} : vector<3x1xf32> to vector<1x1xf32>
    %10 = vector.broadcast %9 : vector<1x1xf32> to vector<1x256xf32>
    %11 = arith.addf %8, %10 : vector<1x256xf32>
    %c0_6 = arith.constant 0 : index
    %c0_7 = arith.constant 0 : index
    %c0_8 = arith.constant 0 : index
    %12 = vector.load %arg5[%c0_6, %c0_7, %c0_8] : memref<2x3x256xf32, #tpu.memory_space<vmem>>, vector<1x1x256xf32>
    %13 = vector.shape_cast %12 : vector<1x1x256xf32> to vector<1x256xf32>
    %14 = vector.shape_cast %11 : vector<1x256xf32> to vector<1x1x256xf32>
    tpu.vector_store %arg5[%c0_6, %c0_7, %c0_8], %14 {strides = array<i32>} : memref<2x3x256xf32, #tpu.memory_space<vmem>>, vector<1x1x256xf32>,
    %15 = vector.extract_strided_slice %0 {offsets = [0, 1], sizes = [4, 1], strides = [1, 1]} : vector<4x3xf32> to vector<4x1xf32>
    %16 = vector.broadcast %15 : vector<4x1xf32> to vector<4x256xf32>
    %17 = arith.mulf %3, %16 : vector<4x256xf32>
    %cst_9 = arith.constant dense<0.000000e+00> : vector<256xf32>
    %18 = vector.multi_reduction <add>, %17, %cst_9 [0] : vector<4x256xf32> to vector<256xf32>
    %19 = vector.shape_cast %18 : vector<256xf32> to vector<1x256xf32>
    %20 = vector.extract_strided_slice %1 {offsets = [1, 0], sizes = [1, 1], strides = [1, 1]} : vector<3x1xf32> to vector<1x1xf32>
    %21 = vector.broadcast %20 : vector<1x1xf32> to vector<1x256xf32>
    %22 = arith.addf %19, %21 : vector<1x256xf32>
    %c0_10 = arith.constant 0 : index
    %c1 = arith.constant 1 : index
    %c0_11 = arith.constant 0 : index
    %23 = vector.load %arg5[%c0_10, %c1, %c0_11] : memref<2x3x256xf32, #tpu.memory_space<vmem>>, vector<1x1x256xf32>
    %24 = vector.shape_cast %23 : vector<1x1x256xf32> to vector<1x256xf32>
    %25 = vector.shape_cast %22 : vector<1x256xf32> to vector<1x1x256xf32>
    tpu.vector_store %arg5[%c0_10, %c1, %c0_11], %25 {strides = array<i32>} : memref<2x3x256xf32, #tpu.memory_space<vmem>>, vector<1x1x256xf32>,
    %26 = vector.extract_strided_slice %0 {offsets = [0, 2], sizes = [4, 1], strides = [1, 1]} : vector<4x3xf32> to vector<4x1xf32>
    %27 = vector.broadcast %26 : vector<4x1xf32> to vector<4x256xf32>
    %28 = arith.mulf %3, %27 : vector<4x256xf32>
    %cst_12 = arith.constant dense<0.000000e+00> : vector<256xf32>
    %29 = vector.multi_reduction <add>, %28, %cst_12 [0] : vector<4x256xf32> to vector<256xf32>
    %30 = vector.shape_cast %29 : vector<256xf32> to vector<1x256xf32>
    %31 = vector.extract_strided_slice %1 {offsets = [2, 0], sizes = [1, 1], strides = [1, 1]} : vector<3x1xf32> to vector<1x1xf32>
    %32 = vector.broadcast %31 : vector<1x1xf32> to vector<1x256xf32>
    %33 = arith.addf %30, %32 : vector<1x256xf32>
    %c0_13 = arith.constant 0 : index
    %c2 = arith.constant 2 : index
    %c0_14 = arith.constant 0 : index
    %34 = vector.load %arg5[%c0_13, %c2, %c0_14] : memref<2x3x256xf32, #tpu.memory_space<vmem>>, vector<1x1x256xf32>
    %35 = vector.shape_cast %34 : vector<1x1x256xf32> to vector<1x256xf32>
    %36 = vector.shape_cast %33 : vector<1x256xf32> to vector<1x1x256xf32>
    tpu.vector_store %arg5[%c0_13, %c2, %c0_14], %36 {strides = array<i32>} : memref<2x3x256xf32, #tpu.memory_space<vmem>>, vector<1x1x256xf32>,
    %c1_15 = arith.constant 1 : index
    %c0_16 = arith.constant 0 : index
    %c0_17 = arith.constant 0 : index
    %37 = vector.load %arg4[%c1_15, %c0_16, %c0_17] : memref<2x4x256xf32, #tpu.memory_space<vmem>>, vector<1x4x256xf32>
    %38 = vector.shape_cast %37 : vector<1x4x256xf32> to vector<4x256xf32>
    %39 = vector.extract_strided_slice %0 {offsets = [0, 0], sizes = [4, 1], strides = [1, 1]} : vector<4x3xf32> to vector<4x1xf32>
    %40 = vector.broadcast %39 : vector<4x1xf32> to vector<4x256xf32>
    %41 = arith.mulf %38, %40 : vector<4x256xf32>
    %cst_18 = arith.constant dense<0.000000e+00> : vector<256xf32>
    %42 = vector.multi_reduction <add>, %41, %cst_18 [0] : vector<4x256xf32> to vector<256xf32>
    %43 = vector.shape_cast %42 : vector<256xf32> to vector<1x256xf32>
    %44 = vector.extract_strided_slice %1 {offsets = [0, 0], sizes = [1, 1], strides = [1, 1]} : vector<3x1xf32> to vector<1x1xf32>
    %45 = vector.broadcast %44 : vector<1x1xf32> to vector<1x256xf32>
    %46 = arith.addf %43, %45 : vector<1x256xf32>
    %c1_19 = arith.constant 1 : index
    %c0_20 = arith.constant 0 : index
    %c0_21 = arith.constant 0 : index
    %47 = vector.load %arg5[%c1_19, %c0_20, %c0_21] : memref<2x3x256xf32, #tpu.memory_space<vmem>>, vector<1x1x256xf32>
    %48 = vector.shape_cast %47 : vector<1x1x256xf32> to vector<1x256xf32>
    %49 = vector.shape_cast %46 : vector<1x256xf32> to vector<1x1x256xf32>
    tpu.vector_store %arg5[%c1_19, %c0_20, %c0_21], %49 {strides = array<i32>} : memref<2x3x256xf32, #tpu.memory_space<vmem>>, vector<1x1x256xf32>,
    %50 = vector.extract_strided_slice %0 {offsets = [0, 1], sizes = [4, 1], strides = [1, 1]} : vector<4x3xf32> to vector<4x1xf32>
    %51 = vector.broadcast %50 : vector<4x1xf32> to vector<4x256xf32>
    %52 = arith.mulf %38, %51 : vector<4x256xf32>
    %cst_22 = arith.constant dense<0.000000e+00> : vector<256xf32>
    %53 = vector.multi_reduction <add>, %52, %cst_22 [0] : vector<4x256xf32> to vector<256xf32>
    %54 = vector.shape_cast %53 : vector<256xf32> to vector<1x256xf32>
    %55 = vector.extract_strided_slice %1 {offsets = [1, 0], sizes = [1, 1], strides = [1, 1]} : vector<3x1xf32> to vector<1x1xf32>
    %56 = vector.broadcast %55 : vector<1x1xf32> to vector<1x256xf32>
    %57 = arith.addf %54, %56 : vector<1x256xf32>
    %c1_23 = arith.constant 1 : index
    %c1_24 = arith.constant 1 : index
    %c0_25 = arith.constant 0 : index
    %58 = vector.load %arg5[%c1_23, %c1_24, %c0_25] : memref<2x3x256xf32, #tpu.memory_space<vmem>>, vector<1x1x256xf32>
    %59 = vector.shape_cast %58 : vector<1x1x256xf32> to vector<1x256xf32>
    %60 = vector.shape_cast %57 : vector<1x256xf32> to vector<1x1x256xf32>
    tpu.vector_store %arg5[%c1_23, %c1_24, %c0_25], %60 {strides = array<i32>} : memref<2x3x256xf32, #tpu.memory_space<vmem>>, vector<1x1x256xf32>,
    %61 = vector.extract_strided_slice %0 {offsets = [0, 2], sizes = [4, 1], strides = [1, 1]} : vector<4x3xf32> to vector<4x1xf32>
    %62 = vector.broadcast %61 : vector<4x1xf32> to vector<4x256xf32>
    %63 = arith.mulf %38, %62 : vector<4x256xf32>
    %cst_26 = arith.constant dense<0.000000e+00> : vector<256xf32>
    %64 = vector.multi_reduction <add>, %63, %cst_26 [0] : vector<4x256xf32> to vector<256xf32>
    %65 = vector.shape_cast %64 : vector<256xf32> to vector<1x256xf32>
    %66 = vector.extract_strided_slice %1 {offsets = [2, 0], sizes = [1, 1], strides = [1, 1]} : vector<3x1xf32> to vector<1x1xf32>
    %67 = vector.broadcast %66 : vector<1x1xf32> to vector<1x256xf32>
    %68 = arith.addf %65, %67 : vector<1x256xf32>
    %c1_27 = arith.constant 1 : index
    %c2_28 = arith.constant 2 : index
    %c0_29 = arith.constant 0 : index
    %69 = vector.load %arg5[%c1_27, %c2_28, %c0_29] : memref<2x3x256xf32, #tpu.memory_space<vmem>>, vector<1x1x256xf32>
    %70 = vector.shape_cast %69 : vector<1x1x256xf32> to vector<1x256xf32>
    %71 = vector.shape_cast %68 : vector<1x256xf32> to vector<1x1x256xf32>
    tpu.vector_store %arg5[%c1_27, %c2_28, %c0_29], %71 {strides = array<i32>} : memref<2x3x256xf32, #tpu.memory_space<vmem>>, vector<1x1x256xf32>,
    return
  }
  func.func @transform_0(%arg0: i32, %arg1: i32) -> (i32, i32) {
    %c0_i32 = arith.constant 0 : i32
    %c0_i32_0 = arith.constant 0 : i32
    %c0_i32_1 = arith.constant 0 : i32
    return %c0_i32, %c0_i32_0 : i32, i32
  }
  func.func @transform_1(%arg0: i32, %arg1: i32) -> (i32, i32) {
    %c0_i32 = arith.constant 0 : i32
    %c0_i32_0 = arith.constant 0 : i32
    %c0_i32_1 = arith.constant 0 : i32
    return %c0_i32, %c0_i32_0 : i32, i32
  }
  func.func @transform_2(%arg0: i32, %arg1: i32) -> (i32, i32, i32) {
    %c0_i32 = arith.constant 0 : i32
    %c0_i32_0 = arith.constant 0 : i32
    return %arg0, %c0_i32, %arg1 : i32, i32, i32
  }
  func.func @transform_3(%arg0: i32, %arg1: i32) -> (i32, i32, i32) {
    %c0_i32 = arith.constant 0 : i32
    %c0_i32_0 = arith.constant 0 : i32
    return %arg0, %c0_i32, %arg1 : i32, i32, i32
  }
}

</mosaic_0001>

<bundles_post_ra>
// kernel: tpu_custom_call.1
= control target key start
LH: loop header
LB: loop body
LE: loop exit
PB: predicated region body
PF: predicated region fallthrough
CT: control target
= control target key end

     0   :  { %8 = vsyncpa [#allocation3], 0  ;;  %s367_s12 = smov [#allocation2]   ;;  %s504_s0 = inlined_call_operand.vmem [shape: f32[4,3], index: 0, kind: input, shape index: {}]   ;;  %s505_s1 = inlined_call_operand.vmem [shape: f32[3,1], index: 1, kind: input, shape index: {}]   ;;  %s506_s2 = inlined_call_operand.hbm [shape: f32[2,4,256], index: 2, kind: input, shape index: {}]   ;;  %s507_s3 = inlined_call_operand.vmem [shape: f32[2,3,256], index: 3, kind: output, shape index: {}]  }
   0x1   :  { %s18_s13 = sshll.u32 %s367_s12, 4  ;;  %s343_s16 = scalar_lea.hbm %s506_s2, 256  ;;  %s19_s13 = int_to_ptr.vmem [resolvable:$true] %s18_s13 }
   0x2   :  { %p344_p0 = scmp.ne.s32.totalorder %s506_s2, %s343_s16  ;;  %p347_p1 = scmp.lt.u32.totalorder %s343_s16, %s506_s2 }
   0x4   :  { %p349_p2 = pnand %p347_p1, %p344_p0 }
   0x6   :  { %352 = shalt.err (!%p349_p2)
}
   0x7   :  { %s353_s21 = scalar_lea.vmem %s19_s13, 256  ;;  %p358_p4 = scmp.lt.s32.totalorder %s19_s13, %s19_s13 }
   0x8   :  { %p354_p3 = scmp.ne.s32.totalorder %s19_s13, %s353_s21  ;;  %p359_p5 = scmp.lt.s32.totalorder %s353_s21, %s353_s21 }
   0xa   :  { %p360_p6 = por %p359_p5, %p358_p4 }
   0xc   :  { %p361_p7 = pnand %p360_p6, %p354_p3 }
   0xe   :  { %364 = shalt.err (!%p361_p7)
}
   0xf   :  { %s368_s22 = smov 128   ;;  %s369_s23 = smov 8  }
  0x10   :  { %24 = dma.hbm_to_vmem [thread:$0]  %s506_s2, 256, %s19_s13, [#allocation3], %s368_s22, %s368_s22, %s369_s23  }
  0x11   :  { %365 = dma.done.wait [#allocation3], 256  }
  0x12   :  { %366 = vsyncadd [#allocation3], 4294967040  ;;  %v370_v0 = vmov 1   ;;  %v371_v1 = vmov 0   ;;  %v28_v2 = vld [vmem:[%s504_s0] sm:$0xf]  ;;  %v38_v7 = vlaneseq }
  0x13   :  { %340 = vset.pattern.permute.xlu0 %v370_v0  ;;  %342 = vset.pattern.permute.xlu1 %v371_v1  ;;  %v29_v3 = vld [vmem:[%s505_s1] sm:$0x7]  ;;  %v372_v4 = vmov 2   ;;  %v373_v5 = vmov 839922192   ;;  %v418_v15 = vld [vmem:[#allocation2 + $0x8] sm:$0xff] }
  0x14   :  { %33 = vperm.xlu1 %342, %v28_v2   ;;  %93 = vperm.xlu0 %340, %v28_v2   ;;  %v36_v6 = vunpack.c.l.s4 %v373_v5  ;;  %v39_v9 = vshrl.u32 %v38_v7, 7  ;;  %v374_v10 = vmov 1966171168   ;;  %v416_v13 = vld [vmem:[#allocation2] sm:$0xff]  ;;  %vm47_vm0 = vcmask 1043456  }
  0x15   :  { %v73_v11 = vunpack.c.l.s4 %v374_v10  ;;  %vm441_vm1 = vcmp.lt.s32.totalorder %v38_v7, 256 }
  0x16   :  { %v37_v8 = vunpack.c.0.s8 %v36_v6 }
  0x17   :  { %v74_v14 = vunpack.c.0.s8 %v73_v11 }
  0x18   :  { %341 = vset.pattern.permute.xlu0 %v372_v4  ;;  %64 = vperm.xlu1 %342, %v29_v3   ;;  %v414_v12 = vsub.s32 %v37_v8, %v39_v9 }
  0x19   :  { %145 = vperm.xlu0 %341, %v28_v2   ;;  %v426_v24 = vsub.s32 %v74_v14, %v39_v9 }
  0x93   :  { %v34_v16 = vpop.permute.xlu1 %33  ;;  %v94_v17 = vpop.permute.xlu0 %93 }
  0x94   :  { %v41_v18 = vrot.slane %v34_v16, %v414_v12  ;;  %v101_v19 = vrot.slane %v94_v17, %v414_v12 }
  0x96   :  { %v43_v20 = vmul.f32 %v41_v18, %v416_v13  ;;  %v198_v21 = vmul.f32 %v418_v15, %v41_v18  ;;  %v103_v22 = vmul.f32 %v101_v19, %v416_v13  ;;  %v238_v23 = vmul.f32 %v418_v15, %v101_v19 }
  0x97   :  { %v436_v18 = vpop.permute.xlu1 %64 }
  0x98   :  { %v45_v25 = vcombine.high %v43_v20, %v43_v20  ;;  %v48_v26 = vsel %vm47_vm0, %v43_v20, 0.0  ;;  %v200_v27 = vcombine.high %v198_v21, %v198_v21  ;;  %v202_v28 = vsel %vm47_vm0, %v198_v21, 0.0  ;;  %v146_v5 = vpop.permute.xlu0 %145 }
  0x99   :  { %v49_v29 = vrot.slane %v48_v26, 4  ;;  %v203_v30 = vrot.slane %v202_v28, 4  ;;  %v105_v31 = vcombine.high %v103_v22, %v103_v22  ;;  %v107_v32 = vsel %vm47_vm0, %v103_v22, 0.0 }
  0x9a   :  { %v55_v33 = vsel %vm47_vm0, %v45_v25, 0.0  ;;  %v209_v34 = vsel %vm47_vm0, %v200_v27, 0.0  ;;  %v108_v35 = vrot.slane %v107_v32, 4  ;;  %v240_v36 = vcombine.high %v238_v23, %v238_v23 }
  0x9b   :  { %v50_v37 = vadd.f32 %v49_v29, %v48_v26  ;;  %v56_v38 = vrot.slane %v55_v33, 4  ;;  %v204_v39 = vadd.f32 %v203_v30, %v202_v28  ;;  %v210_v40 = vrot.slane %v209_v34, 4 }
  0x9c   :  { %v109_v41 = vadd.f32 %v108_v35, %v107_v32  ;;  %v114_v42 = vsel %vm47_vm0, %v105_v31, 0.0  ;;  %v242_v43 = vsel %vm47_vm0, %v238_v23, 0.0  ;;  %v249_v44 = vsel %vm47_vm0, %v240_v36, 0.0 }
  0x9d   :  { %v51_v45 = vrot.slane %v50_v37, 2  ;;  %v57_v46 = vadd.f32 %v56_v38, %v55_v33  ;;  %v205_v47 = vrot.slane %v204_v39, 2  ;;  %v211_v48 = vadd.f32 %v210_v40, %v209_v34 }
  0x9e   :  { %v110_v49 = vrot.slane %v109_v41, 2  ;;  %v115_v50 = vrot.slane %v114_v42, 4  ;;  %v243_v51 = vrot.slane %v242_v43, 4  ;;  %v250_v52 = vrot.slane %v249_v44, 4 }
  0x9f   :  { %v52_v53 = vadd.f32 %v51_v45, %v50_v37  ;;  %v58_v54 = vrot.slane %v57_v46, 2  ;;  %v206_v55 = vadd.f32 %v205_v47, %v204_v39  ;;  %v212_v56 = vrot.slane %v211_v48, 2 }
  0xa0   :  { %v111_v57 = vadd.f32 %v110_v49, %v109_v41  ;;  %v116_v58 = vadd.f32 %v115_v50, %v114_v42  ;;  %v244_v59 = vadd.f32 %v243_v51, %v242_v43  ;;  %v251_v60 = vadd.f32 %v250_v52, %v249_v44 }
  0xa1   :  { %v53_v61 = vrot.slane %v52_v53, 1  ;;  %v59_v62 = vadd.f32 %v58_v54, %v57_v46  ;;  %v207_v63 = vrot.slane %v206_v55, 1  ;;  %v213_v0 = vadd.f32 %v212_v56, %v211_v48 }
  0xa2   :  { %v112_v1 = vrot.slane %v111_v57, 1  ;;  %v117_v2 = vrot.slane %v116_v58, 2  ;;  %v245_v3 = vrot.slane %v244_v59, 2  ;;  %v252_v4 = vrot.slane %v251_v60, 2 }
  0xa3   :  { %v54_v6 = vadd.f32 %v53_v61, %v52_v53  ;;  %v60_v8 = vrot.slane %v59_v62, 1  ;;  %v208_v9 = vadd.f32 %v207_v63, %v206_v55  ;;  %v214_v10 = vrot.slane %v213_v0, 1 }
  0xa4   :  { %v113_v11 = vadd.f32 %v112_v1, %v111_v57  ;;  %v118_v14 = vadd.f32 %v117_v2, %v116_v58  ;;  %v246_v16 = vadd.f32 %v245_v3, %v244_v59  ;;  %v253_v17 = vadd.f32 %v252_v4, %v251_v60 }
  0xa5   :  { %v61_v19 = vadd.f32 %v60_v8, %v59_v62  ;;  %v215_v20 = vadd.f32 %v214_v10, %v213_v0  ;;  %v153_v21 = vrot.slane %v146_v5, %v414_v12  ;;  %v67_v22 = vadd.f32 %v436_v18, %v54_v6 }
  0xa6   :  { %v119_v25 = vrot.slane %v118_v14, 1  ;;  %v247_v26 = vrot.slane %v246_v16, 1  ;;  %v254_v27 = vrot.slane %v253_v17, 1  ;;  %v121_v28 = vadd.f32 %v113_v11, %v436_v18 }
  0xa7   :  { %v155_v29 = vmul.f32 %v153_v21, %v416_v13  ;;  %v279_v30 = vmul.f32 %v418_v15, %v153_v21  ;;  %v68_v31 = vadd.f32 %v436_v18, %v61_v19  ;;  %v216_v12 = vadd.f32 %v208_v9, %v436_v18 }
  0xa8   :  { %v120_v32 = vadd.f32 %v119_v25, %v118_v14  ;;  %v248_v33 = vadd.f32 %v247_v26, %v246_v16  ;;  %v255_v34 = vadd.f32 %v254_v27, %v253_v17  ;;  %v217_v7 = vadd.f32 %v215_v20, %v436_v18 }
  0xa9   :  { %v157_v35 = vcombine.high %v155_v29, %v155_v29  ;;  %v159_v36 = vsel %vm47_vm0, %v155_v29, 0.0  ;;  %v281_v37 = vcombine.high %v279_v30, %v279_v30  ;;  %v283_v38 = vsel %vm47_vm0, %v279_v30, 0.0 }
  0xaa   :  { %v160_v39 = vrot.slane %v159_v36, 4  ;;  %v284_v40 = vrot.slane %v283_v38, 4  ;;  %v71_v13 = vcombine.low %v67_v22, %v68_v31  ;;  %v122_v15 = vadd.f32 %v120_v32, %v436_v18 }
  0xab   :  { %v166_v41 = vsel %vm47_vm0, %v157_v35, 0.0  ;;  %v290_v42 = vsel %vm47_vm0, %v281_v37, 0.0  ;;  %v220_v43 = vcombine.low %v216_v12, %v217_v7  ;;  %v256_v44 = vadd.f32 %v248_v33, %v436_v18 }
  0xac   :  { %v161_v45 = vadd.f32 %v160_v39, %v159_v36  ;;  %v167_v46 = vrot.slane %v166_v41, 4  ;;  %v285_v47 = vadd.f32 %v284_v40, %v283_v38  ;;  %v291_v48 = vrot.slane %v290_v42, 4 }
  0xad   :  { %v78_v49 = vrot.slane %v71_v13, %v426_v24  ;;  %v125_v50 = vcombine.low %v121_v28, %v122_v15  ;;  %v227_v51 = vrot.slane %v220_v43, %v426_v24  ;;  %v257_v52 = vadd.f32 %v255_v34, %v436_v18 }
  0xae   :  { %v162_v53 = vrot.slane %v161_v45, 2  ;;  %v168_v54 = vadd.f32 %v167_v46, %v166_v41  ;;  %v286_v55 = vrot.slane %v285_v47, 2  ;;  %v292_v56 = vadd.f32 %v291_v48, %v290_v42 }
  0xaf   :  { %v85_v57 = vrot.slane %v78_v49, %v426_v24  ;;  %v132_v58 = vrot.slane %v125_v50, %v426_v24  ;;  %v234_v59 = vrot.slane %v227_v51, %v426_v24  ;;  %v260_v60 = vcombine.low %v256_v44, %v257_v52 }
  0xb0   :  { %v163_v61 = vadd.f32 %v162_v53, %v161_v45  ;;  %v169_v62 = vrot.slane %v168_v54, 2  ;;  %v287_v63 = vadd.f32 %v286_v55, %v285_v47  ;;  %v293_v0 = vrot.slane %v292_v56, 2 }
  0xb1   :  { %91 = vst.msk [vmem:[%s507_s3] ss:$4 sm:$0x3] %vm441_vm1, %v85_v57  ;;  %v133_v1 = vcombine.high %v132_v58, %v132_v58  ;;  %329 = vst.msk [vmem:[%s507_s3 + $0x8] ss:$4 sm:$0x3] %vm441_vm1, %v234_v59  ;;  %v267_v2 = vrot.slane %v260_v60, %v426_v24 }
  0xb2   :  { %v164_v3 = vrot.slane %v163_v61, 1  ;;  %v170_v4 = vadd.f32 %v169_v62, %v168_v54  ;;  %v288_v5 = vrot.slane %v287_v63, 1  ;;  %v294_v6 = vadd.f32 %v293_v0, %v292_v56 }
  0xb3   :  { %v140_v8 = vrot.slane %v133_v1, %v426_v24  ;;  %v268_v9 = vcombine.high %v267_v2, %v267_v2 }
  0xb4   :  { %v165_v10 = vadd.f32 %v164_v3, %v163_v61  ;;  %v171_v11 = vrot.slane %v170_v4, 1  ;;  %v289_v14 = vadd.f32 %v288_v5, %v287_v63  ;;  %v295_v16 = vrot.slane %v294_v6, 1 }
  0xb5   :  { %327 = vst.msk [vmem:[%s507_s3 + $0x1] ss:$4 sm:$0x3] %vm441_vm1, %v140_v8  ;;  %v275_v17 = vrot.slane %v268_v9, %v426_v24 }
  0xb6   :  { %v172_v19 = vadd.f32 %v171_v11, %v170_v4  ;;  %v296_v20 = vadd.f32 %v295_v16, %v294_v6  ;;  %v173_v21 = vadd.f32 %v165_v10, %v436_v18  ;;  %v297_v25 = vadd.f32 %v289_v14, %v436_v18 }
  0xb7   :  { %330 = vst.msk [vmem:[%s507_s3 + $0x9] ss:$4 sm:$0x3] %vm441_vm1, %v275_v17 }
  0xb8   :  { %v174_v22 = vadd.f32 %v172_v19, %v436_v18  ;;  %v298_v26 = vadd.f32 %v296_v20, %v436_v18 }
  0xba   :  { %v177_v27 = vcombine.low %v173_v21, %v174_v22  ;;  %v301_v28 = vcombine.low %v297_v25, %v298_v26 }
  0xbc   :  { %v184_v29 = vrot.slane %v177_v27, %v426_v24  ;;  %v308_v30 = vrot.slane %v301_v28, %v426_v24 }
  0xbe   :  { %v191_v31 = vrot.slane %v184_v29, %v426_v24  ;;  %v315_v12 = vrot.slane %v308_v30, %v426_v24 }
  0xc0   :  { %v192_v32 = vcombine.high %v191_v31, %v191_v31  ;;  %v316_v33 = vcombine.high %v315_v12, %v315_v12 }
  0xc2   :  { %328 = vst.msk [vmem:[%s507_s3 + $0x2] ss:$4 sm:$0x3] %vm441_vm1, %v192_v32  ;;  %331 = vst.msk [vmem:[%s507_s3 + $0xa] ss:$4 sm:$0x3] %vm441_vm1, %v316_v33 }
  0xc3   :  { %324 = vsyncpa [#allocation3], 1 }

</bundles_post_ra>
